<compile_context>
chip_gen: v5e
topology: v5e:2x2
jax: 0.10.0
libtpu: 0.0.40
codegen_flags: <defaults>
</compile_context>

<pallas_src>
import jax
import jax.numpy as jnp
from jax import lax
from jax.experimental import pallas as pl
from jax.experimental.pallas import tpu as pltpu

_LANES = 128
_SUB = 8
_CHUNK_ROWS = 512          # (512,128) f32 chunk temporaries ~256 KiB each


def _round_up(a, b):
    return -(-a // b) * b


def _cdiv(a, b):
    return -(-a // b)


def _make_ssd_kernel(block_rows, chunk_rows, rows_valid, masked):
    """Per-block sum-of-squared-differences partial kernel.

    Reduces one (block_rows, 128) tile of x/target into one (8, 128) f32
    partial, streaming `chunk_rows`-row slices so temporaries stay in vregs.
    `masked` is a static Python bool: only True when the last grid block is
    ragged (rows_valid % block_rows != 0); the mask zeroes garbage rows.
    """
    assert block_rows % chunk_rows == 0 and chunk_rows % _SUB == 0
    n_chunks = block_rows // chunk_rows

    def kernel(x_ref, t_ref, partial_ref):
        if masked:
            block_row0 = pl.program_id(0) * block_rows
            # Hoisted out of the loop (JAX does not CSE broadcast_in_dim).
            row_iota = lax.broadcasted_iota(jnp.int32, (chunk_rows, _LANES), 0)

        def body(k, acc):
            row0 = pl.multiple_of(k * chunk_rows, chunk_rows)
            xf = x_ref[pl.ds(row0, chunk_rows), :].astype(jnp.float32)
            tf = t_ref[pl.ds(row0, chunk_rows), :].astype(jnp.float32)
            d = xf - tf
            dd = d * d
            if masked:
                # Rows at/after rows_valid hold unspecified data -> zero them.
                limit = rows_valid - block_row0 - row0          # scalar
                dd = jnp.where(row_iota < limit, dd, 0.0)
            # Fold the chunk into (chunk//8, 8, 128) vreg tiles and sum the
            # leading axis: pure vreg-wise VPU adds, no XLU reduce.
            return acc + jnp.sum(
                dd.reshape(chunk_rows // _SUB, _SUB, _LANES), axis=0)

        partial_ref[...] = lax.fori_loop(
            0, n_chunks, body,
            jnp.zeros((_SUB, _LANES), jnp.float32),
            unroll=True)

    return kernel


def content_loss(x, target, *, block_rows_max=4096, min_kernel_bytes=1 << 20):
    """ContentLoss forward: returns (input_passthrough, mse_loss_scalar)."""
    assert x.shape == target.shape, "input/target shape mismatch"
    assert block_rows_max % _CHUNK_ROWS == 0

    n = x.size
    itemsize = x.dtype.itemsize

    # Small-input fast path: fused XLA beats pallas_call launch + final reduce.
    if n * itemsize < min_kernel_bytes or n < _LANES:
        d = x.astype(jnp.float32) - target.astype(jnp.float32)
        return x, jnp.mean(d * d)

    xf = x.reshape(-1)
    tf = target.reshape(-1)

    # Split off the (<128-element) lane-ragged tail; it is summed in plain JAX
    # so the main slab needs NO padding copy (and when n % 128 == 0 — the
    # common feature-map case — there is no copy at all, just a reshape view).
    n_main = (n // _LANES) * _LANES
    rows_main = n_main // _LANES
    if n_main == n:
        x_main, t_main = xf, tf
        tail_ssd = jnp.float32(0.0)
    else:
        x_main, t_main = xf[:n_main], tf[:n_main]
        dt = xf[n_main:].astype(jnp.float32) - tf[n_main:].astype(jnp.float32)
        tail_ssd = jnp.sum(dt * dt)

    x2 = x_main.reshape(rows_main, _LANES)
    t2 = t_main.reshape(rows_main, _LANES)

    # Block-size selection: aim for >= 2 blocks (v7x megacore split), cap at
    # block_rows_max (2 MiB/input f32 at 4096 rows; 2 inputs x 2 pipeline
    # buffers = 8 MiB, inside the v5e 16 MiB scoped-VMEM default).
    half = _cdiv(rows_main, 2)
    if half <= _CHUNK_ROWS:
        block_rows = _round_up(half, _SUB)
        chunk_rows = block_rows
    else:
        block_rows = min(block_rows_max, _round_up(half, _CHUNK_ROWS))
        chunk_rows = _CHUNK_ROWS
    n_blocks = _cdiv(rows_main, block_rows)
    masked = (rows_main % block_rows) != 0      # ragged last block

    kernel = _make_ssd_kernel(block_rows, chunk_rows, rows_main, masked)

    partials = pl.pallas_call(
        kernel,
        out_shape=jax.ShapeDtypeStruct((n_blocks * _SUB, _LANES), jnp.float32),
        grid_spec=pltpu.PrefetchScalarGridSpec(
            num_scalar_prefetch=0,
            grid=(n_blocks,),
            in_specs=[
                pl.BlockSpec((block_rows, _LANES), lambda i: (i, 0)),
                pl.BlockSpec((block_rows, _LANES), lambda i: (i, 0)),
            ],
            out_specs=pl.BlockSpec((_SUB, _LANES), lambda i: (i, 0)),
        ),
        compiler_params=pltpu.CompilerParams(
            # Independent partial per block -> megacore can split the grid.
            dimension_semantics=("parallel",),
        ),
        cost_estimate=pl.CostEstimate(
            flops=3 * n_main,
            transcendentals=0,
            bytes_accessed=2 * n_main * itemsize + n_blocks * _SUB * _LANES * 4,
        ),
    )(x2, t2)

    loss = (jnp.sum(partials) + tail_ssd) / jnp.float32(n)
    # Passthrough: the module returns its input unchanged (no kernel copy).
    # TODO(synk): nn.Module stores the loss as `self.loss` (stateful side
    # effect); here it is returned as a second output instead.
    return x, loss


if __name__ == "__main__":
    key = jax.random.PRNGKey(0)
    kx, kt = jax.random.split(key)

    # 1) Spec-sized NCHW feature map (2, 4, 16, 16); force the Pallas path so
    #    the kernel itself is exercised despite being below the fast-path cut.
    B, C, H, W = 2, 4, 16, 16
    x = jax.random.normal(kx, (B, C, H, W), dtype=jnp.float32)
    t = jax.random.normal(kt, (B, C, H, W), dtype=jnp.float32)
    out, loss = jax.block_until_ready(content_loss(x, t, min_kernel_bytes=0))
    ref = jnp.mean((x - t) ** 2)
    assert jnp.allclose(out, x), "passthrough mismatch"
    assert jnp.allclose(loss, ref, rtol=1e-6, atol=1e-6), (loss, ref)

    # 2) Larger VGG-style feature map: default path, >= 2 parallel blocks and a
    #    ragged (in-kernel masked) last block, no padding copy.
    x2 = jax.random.normal(kx, (2, 64, 56, 56), dtype=jnp.float32)
    t2 = jax.random.normal(kt, (2, 64, 56, 56), dtype=jnp.float32)
    out2, loss2 = jax.block_until_ready(content_loss(x2, t2))
    ref2 = jnp.mean((x2 - t2) ** 2)
    assert jnp.allclose(out2, x2), "passthrough mismatch (large)"
    assert jnp.allclose(loss2, ref2, rtol=1e-5, atol=1e-6), (loss2, ref2)

    # 3) Flattened size NOT a multiple of 128 (28x28 map): exercises the
    #    lane-ragged-tail split; kernel forced on.
    x3 = jax.random.normal(kx, (1, 3, 28, 28), dtype=jnp.float32)
    t3 = jax.random.normal(kt, (1, 3, 28, 28), dtype=jnp.float32)
    out3, loss3 = jax.block_until_ready(content_loss(x3, t3, min_kernel_bytes=0))
    ref3 = jnp.mean((x3 - t3) ** 2)
    assert jnp.allclose(out3, x3), "passthrough mismatch (ragged)"
    assert jnp.allclose(loss3, ref3, rtol=1e-6, atol=1e-6), (loss3, ref3)

    print("KERNEL_OK")
</pallas_src>

<mosaic_0001>
module attributes {stable_mosaic.version = 11 : i64} {
  func.func @kernel(%arg0: i32, %arg1: memref<8x128xf32, #tpu.memory_space<vmem>>, %arg2: memref<8x128xf32, #tpu.memory_space<vmem>>, %arg3: memref<8x128xf32, #tpu.memory_space<vmem>>) attributes {dimension_semantics = [#tpu.dimension_semantics<parallel>], iteration_bounds = array<i64: 2>, scalar_prefetch = 0 : i64, scratch_operands = 0 : i64, tpu.core_type = #tpu.core_type<tc>, window_params = [{transform_indices = @transform_0, window_bounds = array<i64: 8, 128>}, {transform_indices = @transform_1, window_bounds = array<i64: 8, 128>}, {transform_indices = @transform_2, window_bounds = array<i64: 8, 128>}]} {
    %cst = arith.constant 0.000000e+00 : f32
    %0 = vector.broadcast %cst : f32 to vector<8x128xf32>
    %c0_i32 = arith.constant 0 : i32
    %c8_i32 = arith.constant 8 : i32
    %1 = arith.muli %c0_i32, %c8_i32 : i32
    %2 = tpu.assume_multiple %1, 8 : i32
    %3 = arith.index_cast %2 : i32 to index
    %c0 = arith.constant 0 : index
    %4 = vector.load %arg1[%3, %c0] : memref<8x128xf32, #tpu.memory_space<vmem>>, vector<8x128xf32>
    %5 = arith.index_cast %2 : i32 to index
    %c0_0 = arith.constant 0 : index
    %6 = vector.load %arg2[%5, %c0_0] : memref<8x128xf32, #tpu.memory_space<vmem>>, vector<8x128xf32>
    %7 = arith.subf %4, %6 : vector<8x128xf32>
    %8 = arith.mulf %7, %7 : vector<8x128xf32>
    %9 = vector.shape_cast %8 : vector<8x128xf32> to vector<1x8x128xf32>
    %cst_1 = arith.constant dense<0.000000e+00> : vector<8x128xf32>
    %10 = vector.multi_reduction <add>, %9, %cst_1 [0] : vector<1x8x128xf32> to vector<8x128xf32>
    %11 = arith.addf %0, %10 : vector<8x128xf32>
    %c1_i32 = arith.constant 1 : i32
    %c0_2 = arith.constant 0 : index
    %c0_3 = arith.constant 0 : index
    %12 = vector.load %arg3[%c0_2, %c0_3] : memref<8x128xf32, #tpu.memory_space<vmem>>, vector<8x128xf32>
    tpu.vector_store %arg3[%c0_2, %c0_3], %11 {strides = array<i32>} : memref<8x128xf32, #tpu.memory_space<vmem>>, vector<8x128xf32>,
    return
  }
  func.func @transform_0(%arg0: i32) -> (i32, i32) {
    %c0_i32 = arith.constant 0 : i32
    %c0_i32_0 = arith.constant 0 : i32
    return %arg0, %c0_i32 : i32, i32
  }
  func.func @transform_1(%arg0: i32) -> (i32, i32) {
    %c0_i32 = arith.constant 0 : i32
    %c0_i32_0 = arith.constant 0 : i32
    return %arg0, %c0_i32 : i32, i32
  }
  func.func @transform_2(%arg0: i32) -> (i32, i32) {
    %c0_i32 = arith.constant 0 : i32
    %c0_i32_0 = arith.constant 0 : i32
    return %arg0, %c0_i32 : i32, i32
  }
}

</mosaic_0001>

<bundles_post_ra>
// kernel: tpu_custom_call.1
= control target key start
LH: loop header
LB: loop body
LE: loop exit
PB: predicated region body
PF: predicated region fallthrough
CT: control target
= control target key end

     0   :  { %7 = vsyncpa [#allocation3], 0  ;;  %s689_s0 = inlined_call_operand.hbm [shape: f32[16,128], index: 0, kind: input, shape index: {}]   ;;  %s690_s1 = inlined_call_operand.hbm [shape: f32[16,128], index: 1, kind: input, shape index: {}]   ;;  %s691_s2 = inlined_call_operand.hbm [shape: f32[16,128], index: 2, kind: output, shape index: {}]  }
   0x1   :  { %9 = vsyncpa [#allocation3 + $0x1], 0 }
   0x2   :  { %10 = vsyncpa [#allocation6], 0 }
   0x3   :  { %12 = vsyncpa [#allocation6 + $0x1], 0 }
   0x4   :  { %13 = vsyncpa [#allocation4], 0 }
   0x5   :  { %15 = vsyncpa [#allocation4 + $0x1], 0  ;;  %s529_s9 = smov 0   ;;  %s531_s10 = smov 0  }
   0x6   :  { %s533_s11 = smov 0   ;;  %s535_s12 = smov 0  }
   0x7 LB: > { %s550_s13 = sadd.s32 4294967295, %s512_s12   ;;  %s316_s14 = sadd.s32 4294967294, %s512_s12   ;;  %s512_s12 = sphi %s535_s12, %s702_s12   ;;  %s508_s11 = sphi %s533_s11, %s701_s11   ;;  %s504_s10 = sphi %s531_s10, %s700_s10   ;;  %s500_s9 = sphi %s529_s9, %s699_s9  }
   0x8   : > { %s554_s15 = sadd.s32 1, %s512_s12   ;;  %s28_s16 = sadd.s32 1, %s508_s11 }
   0x9   : > { %s25_s17 = ssub.s32 %s512_s12, %s554_s15  ;;  %p35_p0 = scmp.ne.s32.totalorder %s508_s11, %s504_s10 }
   0xa   : > { %p26_p1 = scmp.eq.s32.totalorder %s25_s17, 0  ;;  %p36_p2 = scmp.eq.s32.totalorder %s512_s12, 0 }
   0xb   : > { %p41_p3 = scmp.ne.s32.totalorder %s504_s10, %s500_s9  ;;  %p42_p4 = scmp.eq.s32.totalorder %s550_s13, 0 }
   0xc   : > { %s566_s18 = scalar_select %p26_p1, %s508_s11, %s28_s16  }
   0xd   : > { %p568_p5 = por %p36_p2, %p35_p0  ;;  %p572_p6 = por %p42_p4, %p41_p3 }
   0xe   : > { %p91_p7 = scmp.eq.s32.totalorder %s550_s13, 1  ;;  %p97_p8 = scmp.eq.s32.totalorder %s316_s14, 1 }
   0xf   : > { %p348_p10 = scmp.lt.s32.totalorder %s512_s12, 2  ;;  %s588_s23 = sand.u32 1, %s508_s11  }
  0x10   : > { %p579_p11 = por %p91_p7, %p35_p0  ;;  %p583_p12 = por %p97_p8, %p41_p3 }
  0x11   : > { %s320_s24 = sshll.u32 %s512_s12, 3  ;;  %s319_s25 = sshll.u32 %s588_s23, 3 }
  0x12   : > { %s125_s28 = scalar_lea.hbm %s689_s0, %s320_s24  ;;  %s121_s30 = scalar_lea.vmem [#allocation2], %s319_s25 }
  0x13   : > { %s127_s29 = sshll.u32 %s125_s28, 4  ;;  %s129_s3 = sshll.u32 %s121_s30, 4  ;;  %s128_s29 = int_to_ptr.hbm [resolvable:$true] %s127_s29  ;;  %s130_s3 = int_to_ptr.vmem [resolvable:$true] %s129_s3 }
  0x14   : > { %p597_p13 = pnand %p348_p10, %p568_p5  ;;  %p323_p0 = scmp.ge.s32.totalorder %s512_s12, 1 }
  0x15   : > { %p153_p1 = scmp.lt.s32.totalorder %s512_s12, 3  ;;  %s118_s5 = scalar_lea.sflag [#allocation3], %s588_s23 }
  0x16   : > { %s382_s6 = sshra.s32 %s128_s29, 4  ;;  %p386_p3 = pneg %p597_p13  ;;  %s383_s6 = int_to_ptr.hbm [resolvable:$true] %s382_s6 }
  0x17   : > { %s384_s7 = scalar_lea.hbm %s383_s6, 8  ;;  %s389_s16 = scalar_lea.hbm %s689_s0, 16 }
  0x18   : > { %p385_p2 = scmp.ne.s32.totalorder %s383_s6, %s384_s7  ;;  %p390_p5 = scmp.lt.s32.totalorder %s383_s6, %s689_s0 }
  0x19   : > { %p391_p8 = scmp.lt.s32.totalorder %s389_s16, %s384_s7 }
  0x1a   : > { %p387_p4 = pnand %p386_p3, %p385_p2 }
  0x1b   : > { %p392_p10 = por %p391_p8, %p390_p5 }
  0x1c   : > { %p388_p7 = pneg %p387_p4 }
  0x1e   : > { %p393_p9 = pnand %p392_p10, %p388_p7 }
  0x20   : > { %396 = shalt.err (!%p393_p9)
}
  0x21   : > { %340 = dma.hbm_to_vmem [thread:$0]  (!%p597_p13), %s128_s29, 128, %s130_s3, %s118_s5  }
  0x22   : > { %p621_p2 = pnand %p323_p0, %p153_p1  ;;  %s144_s30 = scalar_lea.hbm %s690_s1, %s320_s24 }
  0x23   : > { %s146_s6 = sshll.u32 %s144_s30, 4  ;;  %s140_s7 = scalar_lea.vmem [#allocation5], %s319_s25  ;;  %s147_s6 = int_to_ptr.hbm [resolvable:$true] %s146_s6 }
  0x24   : > { %s148_s8 = sshll.u32 %s140_s7, 4  ;;  %s137_s14 = scalar_lea.sflag [#allocation6], %s588_s23  ;;  %s149_s8 = int_to_ptr.vmem [resolvable:$true] %s148_s8 }
  0x25   : > { %s412_s16 = sshra.s32 %s147_s6, 4  ;;  %s419_s5 = scalar_lea.hbm %s690_s1, 16  ;;  %s413_s16 = int_to_ptr.hbm [resolvable:$true] %s412_s16 }
  0x26   : > { %s414_s17 = scalar_lea.hbm %s413_s16, 8  ;;  %p420_p4 = scmp.lt.s32.totalorder %s413_s16, %s690_s1 }
  0x27   : > { %p415_p9 = scmp.ne.s32.totalorder %s413_s16, %s414_s17  ;;  %p421_p7 = scmp.lt.s32.totalorder %s419_s5, %s414_s17 }
  0x29   : > { %p417_p0 = pnand %p415_p9, %p386_p3  ;;  %p422_p5 = por %p421_p7, %p420_p4 }
  0x2b   : > { %p418_p1 = pneg %p417_p0 }
  0x2d   : > { %p423_p8 = pnand %p422_p5, %p418_p1 }
  0x2f   : > { %426 = shalt.err (!%p423_p8)
}
  0x30   : > { %343 = dma.hbm_to_vmem [thread:$0]  (!%p597_p13), %s147_s6, 128, %s149_s8, %s137_s14  }
  0x31   : > { %157 = sbr.rel (%p621_p2) target bundleno = 72 (0x48), region = 28  ;;  %s643_s23 = sand.u32 (!%p621_p2), 1, %s504_s10  }
  0x32   : > { %s324_s25 = sshll.u32 (!%p621_p2), %s643_s23, 3  ;;  %s160_s27 = scalar_lea.sflag (!%p621_p2), [#allocation3], %s643_s23 }
  0x33   : > { %s163_s28 = scalar_lea.vmem (!%p621_p2), [#allocation2], %s324_s25 }
  0x36   : > { %487 = dma.done.wait (%p572_p6), %s160_s27, 128  }
  0x37   : > { %489 = vsyncadd (%p572_p6), %s160_s27, 4294967168  ;;  %s170_s4 = scalar_lea.sflag [#allocation6], %s643_s23  ;;  %s173_s30 = scalar_lea.vmem [#allocation5], %s324_s25 }
  0x38   : > { %491 = dma.done.wait (%p572_p6), %s170_s4, 128  }
  0x39   : > { %493 = vsyncadd (%p572_p6), %s170_s4, 4294967168  ;;  %s328_s26 = sshll.u32 %s550_s13, 3  ;;  %v200_v0 = vld [vmem:[%s163_s28] sm:$0xff]  ;;  %v201_v1 = vld [vmem:[%s173_s30] sm:$0xff]  ;;  %s199_s14 = scalar_lea.vmem [#allocation7], %s324_s25 }
  0x3a   : > { %s218_s8 = scalar_lea.hbm %s691_s2, %s328_s26  ;;  %s220_s16 = sshll.u32 %s199_s14, 4  ;;  %v202_v2 = vsub.f32 %v200_v0, %v201_v1  ;;  %s221_s16 = int_to_ptr.vmem [resolvable:$true] %s220_s16 }
  0x3b   : > { %s222_s17 = sshll.u32 %s218_s8, 4  ;;  %s208_s20 = scalar_lea.sflag [#allocation4], %s643_s23  ;;  %s223_s17 = int_to_ptr.hbm [resolvable:$true] %s222_s17 }
  0x3c   : > { %v203_v3 = vmul.f32 %v202_v2, %v202_v2  ;;  %s456_s29 = sshra.s32 %s223_s17, 4  ;;  %s462_s19 = scalar_lea.hbm %s691_s2, 16  ;;  %s457_s29 = int_to_ptr.hbm [resolvable:$true] %s456_s29 }
  0x3d   : > { %s458_s3 = scalar_lea.hbm %s457_s29, 8  ;;  %p463_p10 = scmp.lt.s32.totalorder %s457_s29, %s691_s2 }
  0x3e   : > { %206 = vst [vmem:[%s199_s14] sm:$0xff] %v203_v3  ;;  %p459_p6 = scmp.ne.s32.totalorder %s457_s29, %s458_s3  ;;  %p464_p2 = scmp.lt.s32.totalorder %s462_s19, %s458_s3 }
  0x40   : > { %p460_p13 = pnand %p459_p6, %p579_p11  ;;  %p465_p9 = por %p464_p2, %p463_p10 }
  0x42   : > { %p461_p3 = pneg %p460_p13 }
  0x44   : > { %p466_p0 = pnand %p465_p9, %p461_p3 }
  0x46   : > { %469 = shalt.err (!%p466_p0)
}
  0x47   : > { %335 = dma.vmem_to_hbm [thread:$0]  (%p579_p11), %s221_s16, 128, %s223_s17, %s208_s20  }
  0x48 PF: > { %s234_s23 = sand.u32 1, %s500_s9   ;;  %p698_p1 = scmp.ge.s32.totalorder %s512_s12, 2 }
  0x49   : > { %s235_s27 = scalar_lea.sflag [#allocation4], %s234_s23 }
  0x4a   : > { %p345_p4 = pnand %p698_p1, %p583_p12 }
  0x4c   : > { %p346_p7 = pneg %p345_p4 }
  0x4e   : > { %495 = dma.done.wait (%p346_p7), %s235_s27, 128  }
  0x4f   : > { %497 = vsyncadd (%p346_p7), %s235_s27, 4294967168  ;;  %p18_p5 = scmp.ge.s32.totalorder %s554_s15, 4   ;;  %s699_s9 = smov %s504_s10 }
  0x50   : > { %s700_s10 = smov %s508_s11  ;;  %s701_s11 = smov %s566_s18 }
  0x51   : > { %s702_s12 = smov %s554_s15  ;;  %20 = sbr.rel (!%p18_p5) target bundleno = 7 (0x7), region = 86 }
  0x56   :  { %241 = vsyncpa [#allocation3], 1 }
  0x57   :  { %243 = vsyncpa [#allocation3 + $0x1], 1 }
  0x58   :  { %244 = vsyncpa [#allocation6], 1 }
  0x59   :  { %246 = vsyncpa [#allocation6 + $0x1], 1 }
  0x5a   :  { %247 = vsyncpa [#allocation4], 1 }
  0x5b   :  { %249 = vsyncpa [#allocation4 + $0x1], 1 }

</bundles_post_ra>
